<compile_context>
chip_gen: v6e
topology: v6e:2x2x1
jax: 0.10.0
libtpu: 0.0.40
codegen_flags: <defaults>
</compile_context>

<pallas_src>
import functools

import jax
import jax.numpy as jnp
from jax.experimental import pallas as pl
from jax.experimental.pallas import tpu as pltpu


def _round_up(v, m):
    return ((v + m - 1) // m) * m


def _pwconv_kernel(x_ref, w_ref, bias_ref, o_ref):
    # x_ref:    (Cin, THW)   input pixels for one (batch, HW-tile), THW lane-dense
    # w_ref:    (Cout, Cin)  bf16 weight with BN scale folded in
    # bias_ref: (Cout, 1)    f32 folded BN bias
    # o_ref:    (Cout, THW)  output tile, THW lane-dense
    x = x_ref[...].astype(jnp.bfloat16)  # MXU-native dtype; f32 accumulation.
    acc = jnp.dot(w_ref[...], x, preferred_element_type=jnp.float32)  # (Cout, THW)
    o_ref[...] = jnp.maximum(acc + bias_ref[...], 0.0).astype(o_ref.dtype)


def _pick_thw(hw, thw_target, n_batch):
    """Lane-dense HW tile: multiple of 128 (or full HW), divisor of HW when possible."""
    if hw <= 128:
        return hw
    t = _round_up(min(thw_target, hw), 128)
    if t >= hw:
        t = hw  # full-extent block: always legal, no masked tail
    else:
        # Prefer the largest multiple of 128 <= target that divides HW exactly
        # (no masked last block); otherwise keep the target and let Pallas mask
        # only the single ragged tail tile.
        for cand in range(t, 127, -128):
            if hw % cand == 0:
                t = cand
                break
    # v7x megacore: with a single batch image make sure both TCs get work.
    if n_batch == 1 and pl.cdiv(hw, t) < 2 and hw > 128:
        t = _round_up(pl.cdiv(hw, 2), 128)
    return t


def _vmem_need_bytes(cin, cout, thw, x_isize, out_isize):
    # Double-buffered x and out blocks + (conservatively double-buffered)
    # grid-invariant weight & bias blocks.
    return (2 * cin * thw * x_isize
            + 2 * cout * thw * out_isize
            + 2 * cout * cin * 2          # bf16 weight
            + 2 * cout * 4)               # f32 bias


def pointwise_conv(x_nchw, weight, bn_gamma, bn_beta, bn_mean, bn_var,
                   *, stride=1, eps=1e-5, thw=1024, out_dtype=None):
    """ReLU(BatchNorm2d(Conv2d(x, weight, k=1, stride, bias=False))), NCHW in/out.

    x_nchw:    (N, Cin, H, W) float32
    weight:    (Cout, Cin)    float32  (the (Cout, Cin, 1, 1) conv weight squeezed)
    bn_*:      (Cout,)        float32  (inference-mode BatchNorm stats/affine)
    out_dtype: output dtype; default = x dtype. Pass jnp.bfloat16 if the
               consumer accepts bf16 (cuts writeback HBM traffic ~in half).
    """
    n, cin, h, w = x_nchw.shape
    cout = weight.shape[0]
    weight = weight.reshape(cout, cin)
    out_dtype = x_nchw.dtype if out_dtype is None else out_dtype

    # Stride for a 1x1 conv is spatial subsampling.
    if stride != 1:
        x_nchw = x_nchw[:, :, ::stride, ::stride]
    ho, wo = x_nchw.shape[2], x_nchw.shape[3]
    hw = ho * wo

    # NCHW-native: (N, Cin, Ho, Wo) -> (N, Cin, HW) is a free reshape (no transpose).
    x_flat = x_nchw.reshape(n, cin, hw)

    # Fold inference BatchNorm: scale into the (bf16) weight, bias stays additive.
    scale = bn_gamma / jnp.sqrt(bn_var + eps)                    # (Cout,)
    w_folded = (weight * scale[:, None]).astype(jnp.bfloat16)    # (Cout, Cin) bf16
    bias = (bn_beta - bn_mean * scale).reshape(cout, 1).astype(jnp.float32)

    x_isize = jnp.dtype(x_flat.dtype).itemsize
    out_isize = jnp.dtype(out_dtype).itemsize

    # Pick HW tile; shrink if the double-buffered working set would not fit
    # comfortably under the 48 MiB cap (safe on v7x's 64 MiB physical VMEM).
    vmem_cap = 48 * 1024 * 1024
    thw_eff = _pick_thw(hw, thw, n)
    while (thw_eff > 128
           and _vmem_need_bytes(cin, cout, thw_eff, x_isize, out_isize) * 1.25 > vmem_cap):
        thw_eff = max(128, _round_up(thw_eff // 2, 128))
    need = _vmem_need_bytes(cin, cout, thw_eff, x_isize, out_isize)
    vmem_limit = int(min(max(need * 1.25, 16 * 1024 * 1024), vmem_cap))

    grid = (n, pl.cdiv(hw, thw_eff))   # no padding: ragged tail (if any) is masked

    # Advisory cost for XLA scheduling around the custom call (consistent, no pad).
    cost = pl.CostEstimate(
        flops=2 * n * hw * cin * cout,
        transcendentals=0,
        bytes_accessed=(n * cin * hw * x_isize
                        + cout * cin * 2 + cout * 4
                        + n * cout * hw * out_isize))

    out_flat = pl.pallas_call(
        _pwconv_kernel,
        out_shape=jax.ShapeDtypeStruct((n, cout, hw), out_dtype),
        grid_spec=pltpu.PrefetchScalarGridSpec(
            num_scalar_prefetch=0,
            grid=grid,
            in_specs=[
                pl.BlockSpec((None, cin, thw_eff), lambda b, j: (b, 0, j)),
                pl.BlockSpec((cout, cin), lambda b, j: (0, 0)),
                pl.BlockSpec((cout, 1), lambda b, j: (0, 0)),
            ],
            out_specs=pl.BlockSpec((None, cout, thw_eff), lambda b, j: (b, 0, j)),
        ),
        compiler_params=pltpu.CompilerParams(
            dimension_semantics=("parallel", "parallel"),
            vmem_limit_bytes=vmem_limit),
        cost_estimate=cost,
    )(x_flat, w_folded, bias)

    # Free reshape back to NCHW (no slice: out_shape already exact HW).
    return out_flat.reshape(n, cout, ho, wo)


def pointwise_conv_ref(x_nchw, weight, bn_gamma, bn_beta, bn_mean, bn_var,
                       *, stride=1, eps=1e-5):
    """Pure-JAX f32 reference (same math, no Pallas)."""
    if stride != 1:
        x_nchw = x_nchw[:, :, ::stride, ::stride]
    y = jnp.einsum("nchw,oc->nohw", x_nchw, weight)
    scale = bn_gamma / jnp.sqrt(bn_var + eps)
    bias = bn_beta - bn_mean * scale
    y = y * scale[None, :, None, None] + bias[None, :, None, None]
    return jnp.maximum(y, 0.0)


if __name__ == "__main__":
    key = jax.random.PRNGKey(0)
    k_x, k_w, k_g, k_b, k_m, k_v = jax.random.split(key, 6)

    N, Cin, H, W = 2, 4, 16, 16
    Cout = 8
    stride = 1

    x = jax.random.normal(k_x, (N, Cin, H, W), dtype=jnp.float32)
    weight = jax.random.normal(k_w, (Cout, Cin), dtype=jnp.float32) * 0.1
    bn_gamma = 1.0 + 0.1 * jax.random.normal(k_g, (Cout,), dtype=jnp.float32)
    bn_beta = 0.1 * jax.random.normal(k_b, (Cout,), dtype=jnp.float32)
    bn_mean = 0.1 * jax.random.normal(k_m, (Cout,), dtype=jnp.float32)
    bn_var = jnp.abs(jax.random.normal(k_v, (Cout,), dtype=jnp.float32)) + 1.0

    fn = functools.partial(pointwise_conv, stride=stride)
    out = jax.jit(fn)(x, weight, bn_gamma, bn_beta, bn_mean, bn_var)
    out = jax.block_until_ready(out)

    ref = pointwise_conv_ref(x, weight, bn_gamma, bn_beta, bn_mean, bn_var,
                             stride=stride)
    assert out.shape == (N, Cout, H // stride, W // stride), out.shape
    # bf16 matmul inputs (deliberate perf tradeoff) -> loosened tolerance vs f32 ref.
    assert jnp.allclose(out, ref, atol=3e-2, rtol=3e-2), "mismatch vs reference"

    print("KERNEL_OK")
</pallas_src>

<mosaic_0001>
module attributes {stable_mosaic.version = 11 : i64} {
  func.func @_pwconv_kernel(%arg0: i32, %arg1: i32, %arg2: memref<1x4x256xf32, #tpu.memory_space<vmem>>, %arg3: memref<8x4xbf16, #tpu.memory_space<vmem>>, %arg4: memref<8x1xf32, #tpu.memory_space<vmem>>, %arg5: memref<1x8x256xf32, #tpu.memory_space<vmem>>) attributes {dimension_semantics = [#tpu.dimension_semantics<parallel>, #tpu.dimension_semantics<parallel>], iteration_bounds = array<i64: 2, 1>, scalar_prefetch = 0 : i64, scratch_operands = 0 : i64, tpu.core_type = #tpu.core_type<tc>, window_params = [{transform_indices = @transform_0, window_bounds = array<i64: 1, 4, 256>}, {pipeline_mode = #tpu.pipeline_mode<synchronous>, transform_indices = @transform_1, window_bounds = array<i64: 8, 4>}, {pipeline_mode = #tpu.pipeline_mode<synchronous>, transform_indices = @transform_2, window_bounds = array<i64: 8, 1>}, {transform_indices = @transform_3, window_bounds = array<i64: 1, 8, 256>}]} {
    %c0 = arith.constant 0 : index
    %c0_0 = arith.constant 0 : index
    %c0_1 = arith.constant 0 : index
    %0 = vector.load %arg2[%c0, %c0_0, %c0_1] : memref<1x4x256xf32, #tpu.memory_space<vmem>>, vector<1x4x256xf32>
    %1 = vector.shape_cast %0 : vector<1x4x256xf32> to vector<4x256xf32>
    %2 = arith.truncf %1 : vector<4x256xf32> to vector<4x256xbf16>
    %c0_2 = arith.constant 0 : index
    %c0_3 = arith.constant 0 : index
    %3 = vector.load %arg3[%c0_2, %c0_3] : memref<8x4xbf16, #tpu.memory_space<vmem>>, vector<8x4xbf16>
    %cst = arith.constant dense<0.000000e+00> : vector<8x256xf32>
    %4 = tpu.matmul %3, %2, %cst {dimension_numbers = #tpu.dot_dimension_numbers<[1], [0], [0], [1], [0, 0, 1, 1], [], []>} : vector<8x4xbf16>, vector<4x256xbf16>, vector<8x256xf32> -> vector<8x256xf32>
    %c0_4 = arith.constant 0 : index
    %c0_5 = arith.constant 0 : index
    %5 = vector.load %arg4[%c0_4, %c0_5] : memref<8x1xf32, #tpu.memory_space<vmem>>, vector<8x1xf32>
    %6 = vector.broadcast %5 : vector<8x1xf32> to vector<8x256xf32>
    %7 = arith.addf %4, %6 : vector<8x256xf32>
    %cst_6 = arith.constant 0.000000e+00 : f32
    %8 = vector.broadcast %cst_6 : f32 to vector<8x256xf32>
    %9 = arith.maximumf %7, %8 : vector<8x256xf32>
    %c0_7 = arith.constant 0 : index
    %c0_8 = arith.constant 0 : index
    %c0_9 = arith.constant 0 : index
    %10 = vector.load %arg5[%c0_7, %c0_8, %c0_9] : memref<1x8x256xf32, #tpu.memory_space<vmem>>, vector<1x8x256xf32>
    %11 = vector.shape_cast %10 : vector<1x8x256xf32> to vector<8x256xf32>
    %12 = vector.shape_cast %9 : vector<8x256xf32> to vector<1x8x256xf32>
    tpu.vector_store %arg5[%c0_7, %c0_8, %c0_9], %12 {strides = array<i32>} : memref<1x8x256xf32, #tpu.memory_space<vmem>>, vector<1x8x256xf32>,
    return
  }
  func.func @transform_0(%arg0: i32, %arg1: i32) -> (i32, i32, i32) {
    %c0_i32 = arith.constant 0 : i32
    %c0_i32_0 = arith.constant 0 : i32
    return %arg0, %c0_i32, %arg1 : i32, i32, i32
  }
  func.func @transform_1(%arg0: i32, %arg1: i32) -> (i32, i32) {
    %c0_i32 = arith.constant 0 : i32
    %c0_i32_0 = arith.constant 0 : i32
    %c0_i32_1 = arith.constant 0 : i32
    return %c0_i32, %c0_i32_0 : i32, i32
  }
  func.func @transform_2(%arg0: i32, %arg1: i32) -> (i32, i32) {
    %c0_i32 = arith.constant 0 : i32
    %c0_i32_0 = arith.constant 0 : i32
    %c0_i32_1 = arith.constant 0 : i32
    return %c0_i32, %c0_i32_0 : i32, i32
  }
  func.func @transform_3(%arg0: i32, %arg1: i32) -> (i32, i32, i32) {
    %c0_i32 = arith.constant 0 : i32
    %c0_i32_0 = arith.constant 0 : i32
    return %arg0, %c0_i32, %arg1 : i32, i32, i32
  }
}

</mosaic_0001>

<bundles_post_ra>
// kernel: pointwise_conv.1
= control target key start
LH: loop header
LB: loop body
LE: loop exit
PB: predicated region body
PF: predicated region fallthrough
CT: control target
= control target key end

     0   :  { %s454_s12 = smov 0   ;;  %s456_s13 = smov 0   ;;  %s493_s0 = inlined_call_operand.vmem [shape: f32[2,4,256], index: 0, kind: input, shape index: {}]   ;;  %s494_s1 = inlined_call_operand.vmem [shape: bf16[8,4], index: 1, kind: input, shape index: {}]   ;;  %s495_s2 = inlined_call_operand.vmem [shape: f32[8,1], index: 2, kind: input, shape index: {}]   ;;  %s496_s3 = inlined_call_operand.vmem [shape: f32[2,8,256], index: 3, kind: output, shape index: {}]  }
   0x1   :  { %s458_s14 = smov 0  }
   0x2 LB: > { %s25_s15 = sadd.s32 1, %s427_s13  ;;  %p371_p0 = scmp.ge.s32.totalorder %s431_s14, 1  ;;  %s431_s14 = sphi %s458_s14, %s13_s14   ;;  %s427_s13 = sphi %s456_s13, %s498_s13   ;;  %s423_s12 = sphi %s454_s12, %s497_s12  }
   0x3   : > { %p27_p1 = scmp.ge.s32.totalorder %s25_s15, 2  ;;  %p158_p2 = scmp.lt.s32.totalorder %s431_s14, 3 }
   0x5   : > { %s500_s15 = smov (%p27_p1, %s25_s15), 0  ;;  %p159_p3 = pnand %p371_p0, %p158_p2 }
   0x6   : > { %p191_p4 = scmp.lt.s32.totalorder (!%p159_p3), %s423_s12, 1 }
   0x7   : > { %162 = sbr.rel (%p159_p3) target bundleno = 224 (0xe0), region = 32 }
   0xc   : > { %v433_v0 = vmov 0   ;;  %v218_v1 = vld [vmem:[%s495_s2] sm:$0xff]  ;;  %s502_s12 = smov (!%p191_p4, %s423_s12), 1  ;;  %vm228_vm0 = vcmask 1041408   ;;  %vm224_vm1 = vcmask 31744  }
   0xd   : > { %267 = vmatprep.mubr.bf16.mxu0 %v433_v0  ;;  %407 = vset.pattern.permute.xlu0 %v433_v0  ;;  %s380_s18 = sshll.u32 %s502_s12, 3  ;;  %v217_v7 = vld [vmem:[%s494_s1] sm:$0xf]  ;;  %s381_s24 = sshll.u32 %s502_s12, 4 }
   0xe   : > { %221 = vperm.xlu0 %407, %v218_v1   ;;  %s198_s21 = scalar_lea.vmem %s493_s0, %s380_s18  ;;  %s208_s27 = scalar_lea.vmem %s496_s3, %s381_s24 }
   0xf   : > { %v211_v2 = vld [vmem:[%s198_s21] sm:$0xff] }
  0x10   : > { %v213_v3 = vcombine.high %v211_v2, %v211_v2  ;;  %v215_v4 = vpack.c.bf16 %v211_v2, %v211_v2 }
  0x12   : > { %v216_v5 = vpack.c.bf16 %v213_v3, %v213_v3  ;;  %v230_v6 = vsel %vm228_vm0, %v215_v4, 0 }
  0x14   : > { %376 = vmatprep.subr.msk.bf16.mxu0 %vm228_vm0, %v216_v5 }
  0x15   : > { %250 = vmatpush1.bf16.msra.mxu0 %v230_v6 }
  0x18   : > { %377 = vmatmul.mubr.msk.bf16.vlgmr.msra.gmra.mxu0 %vm224_vm1, %v217_v7 }
  0x89   : > { %v222_v8 = vpop.permute.xlu0 %221 }
  0xd8   : > { %v269_v9 = vpop.f32.mrf.mxu0 }
  0xd9   : > { %v270_v10 = vadd.f32 %v269_v9, %v222_v8 }
  0xda   : > { %v271_v11 = vpop.f32.mrf.mxu0 }
  0xdb   : > { %v276_v12 = vmax.f32 %v270_v10, 0.0  ;;  %v272_v13 = vadd.f32 %v271_v11, %v222_v8 }
  0xdc   : > { %v273_v14 = vpop.f32.mrf.mxu0 }
  0xdd   : > { %278 = vst [vmem:[%s208_s27] sm:$0xff] %v276_v12  ;;  %v277_v15 = vmax.f32 %v272_v13, 0.0 }
  0xde   : > { %v274_v16 = vpop.f32.mrf.mxu0 }
  0xdf   : > { %279 = vst [vmem:[%s208_s27 + $0x8] sm:$0xff] %v277_v15 }
  0xe0 PF: > { %s13_s14 = sadd.s32 1, %s431_s14   ;;  %s497_s12 = smov %s427_s13 }
  0xe1   : > { %p10_p5 = scmp.ge.s32.totalorder %s13_s14, 4   ;;  %s498_s13 = smov %s500_s15 }
  0xe3   :  { %12 = sbr.rel (!%p10_p5) target bundleno = 2 (0x2), region = 62 }

</bundles_post_ra>
